<compile_context>
chip_gen: v7x
topology: tpu7x:2x2x1
jax: 0.10.0
libtpu: 0.0.40
codegen_flags: <defaults>
</compile_context>

<pallas_src>
import functools

import jax
import jax.numpy as jnp
from jax.experimental import pallas as pl
from jax.experimental.pallas import tpu as pltpu

HIDDEN = 128
N_LAYERS = 3            # extra 128->128 hidden layers (PyTorch default n_layers=3)
LANE = 128
SUBLANE = 8
_VMEM_ACT_BUDGET = 12 * 1024 * 1024   # activation budget used to cap tile_m
_VMEM_LIMIT = 32 * 1024 * 1024        # raise v5e's 16 MiB scoped default; safe on all chips


def _round_up(x, m):
    return (x + m - 1) // m * m


def _mlp_kernel(*refs, compute_dtype, out_dim):
    """One batch tile: (1+n_layers) x (matmul + bias + relu), then matmul + bias."""
    x_ref, o_ref = refs[0], refs[-1]
    wb_refs = refs[1:-1]
    n_linear = len(wb_refs) // 2

    h = x_ref[...].astype(compute_dtype)       # cast after load (no extra HBM pass)
    for li in range(n_linear):
        w_ref, b_ref = wb_refs[2 * li], wb_refs[2 * li + 1]
        acc = jnp.dot(h, w_ref[...], preferred_element_type=jnp.float32)
        acc = acc + b_ref[...]                  # bias added in f32 after f32 accumulation
        if li < n_linear - 1:
            h = jnp.maximum(acc, 0.0).astype(compute_dtype)
        else:
            # Classifier columns are 128-padded for the MXU; store only the real ones.
            o_ref[...] = acc[:, :out_dim].astype(o_ref.dtype)


def nonlinear_classifier_forward(x, params, *, compute_dtype=jnp.bfloat16,
                                 tile_m=4096, interpret=False):
    """params: list of (W, b), W pre-transposed to (in, out), b shaped (1, out).

    compute_dtype=bf16 (default) halves matmul-operand bytes and runs the MXU at
    native bf16 rate on v5e/v6e/v7x; accumulation stays f32.  Pass
    compute_dtype=jnp.float32 when tight tolerances are required.
    """
    batch, in_dim = x.shape
    out_dim = params[-1][0].shape[1]

    # Pad classifier columns to a lane multiple for the MXU (free); store stays out_dim wide.
    out_pad = _round_up(out_dim, LANE)
    wc, bc = params[-1]
    if out_pad != out_dim:
        wc = jnp.pad(wc, ((0, 0), (0, out_pad - out_dim)))
        bc = jnp.pad(bc, ((0, 0), (0, out_pad - out_dim)))
    padded_params = list(params[:-1]) + [(wc, bc)]

    # --- batch tile selection -------------------------------------------------
    row_align = 16 if jnp.dtype(compute_dtype) == jnp.dtype(jnp.bfloat16) else SUBLANE
    x_bytes = jnp.dtype(x.dtype).itemsize
    # Rough per-row VMEM: double-buffered x block + f32 hidden temporaries + 2x out block.
    per_row = 2 * in_dim * x_bytes + 4 * HIDDEN * 4 + 2 * out_dim * 4
    row_cap = max(row_align, (_VMEM_ACT_BUDGET // per_row) // row_align * row_align)

    tile_m = max(row_align, min(tile_m, row_cap, _round_up(batch, row_align)))
    tile_m = _round_up(tile_m, row_align)
    # v7x has 2 TensorCores: keep >=2 grid steps on the "parallel" axis when the
    # batch is big enough so both cores get work.
    if pl.cdiv(batch, tile_m) < 2 and batch > 2 * row_align:
        tile_m = _round_up(pl.cdiv(batch, 2), row_align)

    grid = (pl.cdiv(batch, tile_m),)

    # x tiled over batch (DMA'd in its own dtype); weights/biases use constant
    # index_maps so they are fetched once and stay VMEM-resident across steps.
    flat_args = [x]
    in_specs = [pl.BlockSpec((tile_m, in_dim), lambda i: (i, 0))]
    for w, b in padded_params:
        flat_args.append(w.astype(compute_dtype))
        flat_args.append(b.astype(jnp.float32))          # biases stay f32
        in_specs.append(pl.BlockSpec(w.shape, lambda i: (0, 0)))
        in_specs.append(pl.BlockSpec(b.shape, lambda i: (0, 0)))

    out_specs = pl.BlockSpec((tile_m, out_dim), lambda i: (i, 0))

    out = pl.pallas_call(
        functools.partial(_mlp_kernel, compute_dtype=compute_dtype, out_dim=out_dim),
        grid=grid,
        out_shape=jax.ShapeDtypeStruct((batch, out_dim), x.dtype),
        in_specs=in_specs,
        out_specs=out_specs,
        compiler_params=pltpu.CompilerParams(
            dimension_semantics=("parallel",),
            vmem_limit_bytes=_VMEM_LIMIT),
        interpret=interpret,
    )(*flat_args)
    return out


def init_params(key, in_dim, out_dim):
    """PyTorch-style nn.Linear init (uniform +/- 1/sqrt(fan_in)).
    Weights pre-transposed to (in, out); biases shaped (1, out)."""
    dims = [(in_dim, HIDDEN)]
    for _ in range(N_LAYERS):
        dims.append((HIDDEN, HIDDEN))
    dims.append((HIDDEN, out_dim))

    params = []
    for (fan_in, fan_out) in dims:
        key, kw, kb = jax.random.split(key, 3)
        bound = 1.0 / (fan_in ** 0.5)
        w = jax.random.uniform(kw, (fan_in, fan_out), jnp.float32, -bound, bound)
        b = jax.random.uniform(kb, (1, fan_out), jnp.float32, -bound, bound)
        params.append((w, b))
    return params


def _reference_forward(x, params):
    h = x
    for w, b in params[:-1]:
        h = jnp.maximum(h @ w + b, 0.0)
    w, b = params[-1]
    return h @ w + b


if __name__ == "__main__":
    key = jax.random.PRNGKey(0)
    batch, in_dim, out_dim = 8, 32, 10

    key, kx = jax.random.split(key)
    x = jax.random.normal(kx, (batch, in_dim), jnp.float32)
    params = init_params(key, in_dim, out_dim)
    ref = _reference_forward(x, params)

    # f32 operands for the tight-tolerance check.
    out_f32 = nonlinear_classifier_forward(x, params, compute_dtype=jnp.float32)
    out_f32 = jax.block_until_ready(out_f32)
    assert out_f32.shape == (batch, out_dim)
    assert jnp.allclose(out_f32, ref, atol=1e-4, rtol=1e-4)

    # Default path: bf16 MXU operands, f32 accumulation (relaxed tolerance).
    out_bf16 = nonlinear_classifier_forward(x, params)
    out_bf16 = jax.block_until_ready(out_bf16)
    assert out_bf16.shape == (batch, out_dim)
    assert bool(jnp.all(jnp.isfinite(out_bf16)))
    assert jnp.allclose(out_bf16, ref, atol=5e-2, rtol=5e-2)

    print("KERNEL_OK")
</pallas_src>

<mosaic_0001>
module attributes {stable_mosaic.version = 11 : i64} {
  func.func @_mlp_kernel(%arg0: i32, %arg1: memref<8x32xf32, #tpu.memory_space<vmem>>, %arg2: memref<32x128xf32, #tpu.memory_space<vmem>>, %arg3: memref<1x128xf32, #tpu.memory_space<vmem>>, %arg4: memref<128x128xf32, #tpu.memory_space<vmem>>, %arg5: memref<1x128xf32, #tpu.memory_space<vmem>>, %arg6: memref<128x128xf32, #tpu.memory_space<vmem>>, %arg7: memref<1x128xf32, #tpu.memory_space<vmem>>, %arg8: memref<128x128xf32, #tpu.memory_space<vmem>>, %arg9: memref<1x128xf32, #tpu.memory_space<vmem>>, %arg10: memref<128x128xf32, #tpu.memory_space<vmem>>, %arg11: memref<1x128xf32, #tpu.memory_space<vmem>>, %arg12: memref<8x10xf32, #tpu.memory_space<vmem>>) attributes {dimension_semantics = [#tpu.dimension_semantics<parallel>], iteration_bounds = array<i64: 1>, scalar_prefetch = 0 : i64, scratch_operands = 0 : i64, tpu.core_type = #tpu.core_type<tc>, window_params = [{transform_indices = @transform_0, window_bounds = array<i64: 8, 32>}, {pipeline_mode = #tpu.pipeline_mode<synchronous>, transform_indices = @transform_1, window_bounds = array<i64: 32, 128>}, {pipeline_mode = #tpu.pipeline_mode<synchronous>, transform_indices = @transform_2, window_bounds = array<i64: 1, 128>}, {pipeline_mode = #tpu.pipeline_mode<synchronous>, transform_indices = @transform_3, window_bounds = array<i64: 128, 128>}, {pipeline_mode = #tpu.pipeline_mode<synchronous>, transform_indices = @transform_4, window_bounds = array<i64: 1, 128>}, {pipeline_mode = #tpu.pipeline_mode<synchronous>, transform_indices = @transform_5, window_bounds = array<i64: 128, 128>}, {pipeline_mode = #tpu.pipeline_mode<synchronous>, transform_indices = @transform_6, window_bounds = array<i64: 1, 128>}, {pipeline_mode = #tpu.pipeline_mode<synchronous>, transform_indices = @transform_7, window_bounds = array<i64: 128, 128>}, {pipeline_mode = #tpu.pipeline_mode<synchronous>, transform_indices = @transform_8, window_bounds = array<i64: 1, 128>}, {pipeline_mode = #tpu.pipeline_mode<synchronous>, transform_indices = @transform_9, window_bounds = array<i64: 128, 128>}, {pipeline_mode = #tpu.pipeline_mode<synchronous>, transform_indices = @transform_10, window_bounds = array<i64: 1, 128>}, {transform_indices = @transform_11, window_bounds = array<i64: 8, 10>}]} {
    %c0 = arith.constant 0 : index
    %c0_0 = arith.constant 0 : index
    %0 = vector.load %arg1[%c0, %c0_0] : memref<8x32xf32, #tpu.memory_space<vmem>>, vector<8x32xf32>
    %c0_1 = arith.constant 0 : index
    %c0_2 = arith.constant 0 : index
    %1 = vector.load %arg2[%c0_1, %c0_2] : memref<32x128xf32, #tpu.memory_space<vmem>>, vector<32x128xf32>
    %cst = arith.constant dense<0.000000e+00> : vector<8x128xf32>
    %2 = tpu.matmul %0, %1, %cst {dimension_numbers = #tpu.dot_dimension_numbers<[1], [0], [0], [1], [0, 0, 1, 1], [], []>} : vector<8x32xf32>, vector<32x128xf32>, vector<8x128xf32> -> vector<8x128xf32>
    %c0_3 = arith.constant 0 : index
    %c0_4 = arith.constant 0 : index
    %3 = vector.load %arg3[%c0_3, %c0_4] : memref<1x128xf32, #tpu.memory_space<vmem>>, vector<1x128xf32>
    %4 = vector.broadcast %3 : vector<1x128xf32> to vector<8x128xf32>
    %5 = arith.addf %2, %4 : vector<8x128xf32>
    %cst_5 = arith.constant 0.000000e+00 : f32
    %6 = vector.broadcast %cst_5 : f32 to vector<8x128xf32>
    %7 = arith.maximumf %5, %6 : vector<8x128xf32>
    %c0_6 = arith.constant 0 : index
    %c0_7 = arith.constant 0 : index
    %8 = vector.load %arg4[%c0_6, %c0_7] : memref<128x128xf32, #tpu.memory_space<vmem>>, vector<128x128xf32>
    %cst_8 = arith.constant dense<0.000000e+00> : vector<8x128xf32>
    %9 = tpu.matmul %7, %8, %cst_8 {dimension_numbers = #tpu.dot_dimension_numbers<[1], [0], [0], [1], [0, 0, 1, 1], [], []>} : vector<8x128xf32>, vector<128x128xf32>, vector<8x128xf32> -> vector<8x128xf32>
    %c0_9 = arith.constant 0 : index
    %c0_10 = arith.constant 0 : index
    %10 = vector.load %arg5[%c0_9, %c0_10] : memref<1x128xf32, #tpu.memory_space<vmem>>, vector<1x128xf32>
    %11 = vector.broadcast %10 : vector<1x128xf32> to vector<8x128xf32>
    %12 = arith.addf %9, %11 : vector<8x128xf32>
    %cst_11 = arith.constant 0.000000e+00 : f32
    %13 = vector.broadcast %cst_11 : f32 to vector<8x128xf32>
    %14 = arith.maximumf %12, %13 : vector<8x128xf32>
    %c0_12 = arith.constant 0 : index
    %c0_13 = arith.constant 0 : index
    %15 = vector.load %arg6[%c0_12, %c0_13] : memref<128x128xf32, #tpu.memory_space<vmem>>, vector<128x128xf32>
    %cst_14 = arith.constant dense<0.000000e+00> : vector<8x128xf32>
    %16 = tpu.matmul %14, %15, %cst_14 {dimension_numbers = #tpu.dot_dimension_numbers<[1], [0], [0], [1], [0, 0, 1, 1], [], []>} : vector<8x128xf32>, vector<128x128xf32>, vector<8x128xf32> -> vector<8x128xf32>
    %c0_15 = arith.constant 0 : index
    %c0_16 = arith.constant 0 : index
    %17 = vector.load %arg7[%c0_15, %c0_16] : memref<1x128xf32, #tpu.memory_space<vmem>>, vector<1x128xf32>
    %18 = vector.broadcast %17 : vector<1x128xf32> to vector<8x128xf32>
    %19 = arith.addf %16, %18 : vector<8x128xf32>
    %cst_17 = arith.constant 0.000000e+00 : f32
    %20 = vector.broadcast %cst_17 : f32 to vector<8x128xf32>
    %21 = arith.maximumf %19, %20 : vector<8x128xf32>
    %c0_18 = arith.constant 0 : index
    %c0_19 = arith.constant 0 : index
    %22 = vector.load %arg8[%c0_18, %c0_19] : memref<128x128xf32, #tpu.memory_space<vmem>>, vector<128x128xf32>
    %cst_20 = arith.constant dense<0.000000e+00> : vector<8x128xf32>
    %23 = tpu.matmul %21, %22, %cst_20 {dimension_numbers = #tpu.dot_dimension_numbers<[1], [0], [0], [1], [0, 0, 1, 1], [], []>} : vector<8x128xf32>, vector<128x128xf32>, vector<8x128xf32> -> vector<8x128xf32>
    %c0_21 = arith.constant 0 : index
    %c0_22 = arith.constant 0 : index
    %24 = vector.load %arg9[%c0_21, %c0_22] : memref<1x128xf32, #tpu.memory_space<vmem>>, vector<1x128xf32>
    %25 = vector.broadcast %24 : vector<1x128xf32> to vector<8x128xf32>
    %26 = arith.addf %23, %25 : vector<8x128xf32>
    %cst_23 = arith.constant 0.000000e+00 : f32
    %27 = vector.broadcast %cst_23 : f32 to vector<8x128xf32>
    %28 = arith.maximumf %26, %27 : vector<8x128xf32>
    %c0_24 = arith.constant 0 : index
    %c0_25 = arith.constant 0 : index
    %29 = vector.load %arg10[%c0_24, %c0_25] : memref<128x128xf32, #tpu.memory_space<vmem>>, vector<128x128xf32>
    %cst_26 = arith.constant dense<0.000000e+00> : vector<8x128xf32>
    %30 = tpu.matmul %28, %29, %cst_26 {dimension_numbers = #tpu.dot_dimension_numbers<[1], [0], [0], [1], [0, 0, 1, 1], [], []>} : vector<8x128xf32>, vector<128x128xf32>, vector<8x128xf32> -> vector<8x128xf32>
    %c0_27 = arith.constant 0 : index
    %c0_28 = arith.constant 0 : index
    %31 = vector.load %arg11[%c0_27, %c0_28] : memref<1x128xf32, #tpu.memory_space<vmem>>, vector<1x128xf32>
    %32 = vector.broadcast %31 : vector<1x128xf32> to vector<8x128xf32>
    %33 = arith.addf %30, %32 : vector<8x128xf32>
    %34 = vector.extract_strided_slice %33 {offsets = [0, 0], sizes = [8, 10], strides = [1, 1]} : vector<8x128xf32> to vector<8x10xf32>
    %c0_29 = arith.constant 0 : index
    %c0_30 = arith.constant 0 : index
    %35 = vector.load %arg12[%c0_29, %c0_30] : memref<8x10xf32, #tpu.memory_space<vmem>>, vector<8x10xf32>
    tpu.vector_store %arg12[%c0_29, %c0_30], %34 {strides = array<i32>} : memref<8x10xf32, #tpu.memory_space<vmem>>, vector<8x10xf32>,
    return
  }
  func.func @transform_0(%arg0: i32) -> (i32, i32) {
    %c0_i32 = arith.constant 0 : i32
    %c0_i32_0 = arith.constant 0 : i32
    return %arg0, %c0_i32 : i32, i32
  }
  func.func @transform_1(%arg0: i32) -> (i32, i32) {
    %c0_i32 = arith.constant 0 : i32
    %c0_i32_0 = arith.constant 0 : i32
    %c0_i32_1 = arith.constant 0 : i32
    return %c0_i32, %c0_i32_0 : i32, i32
  }
  func.func @transform_2(%arg0: i32) -> (i32, i32) {
    %c0_i32 = arith.constant 0 : i32
    %c0_i32_0 = arith.constant 0 : i32
    %c0_i32_1 = arith.constant 0 : i32
    return %c0_i32, %c0_i32_0 : i32, i32
  }
  func.func @transform_3(%arg0: i32) -> (i32, i32) {
    %c0_i32 = arith.constant 0 : i32
    %c0_i32_0 = arith.constant 0 : i32
    %c0_i32_1 = arith.constant 0 : i32
    return %c0_i32, %c0_i32_0 : i32, i32
  }
  func.func @transform_4(%arg0: i32) -> (i32, i32) {
    %c0_i32 = arith.constant 0 : i32
    %c0_i32_0 = arith.constant 0 : i32
    %c0_i32_1 = arith.constant 0 : i32
    return %c0_i32, %c0_i32_0 : i32, i32
  }
  func.func @transform_5(%arg0: i32) -> (i32, i32) {
    %c0_i32 = arith.constant 0 : i32
    %c0_i32_0 = arith.constant 0 : i32
    %c0_i32_1 = arith.constant 0 : i32
    return %c0_i32, %c0_i32_0 : i32, i32
  }
  func.func @transform_6(%arg0: i32) -> (i32, i32) {
    %c0_i32 = arith.constant 0 : i32
    %c0_i32_0 = arith.constant 0 : i32
    %c0_i32_1 = arith.constant 0 : i32
    return %c0_i32, %c0_i32_0 : i32, i32
  }
  func.func @transform_7(%arg0: i32) -> (i32, i32) {
    %c0_i32 = arith.constant 0 : i32
    %c0_i32_0 = arith.constant 0 : i32
    %c0_i32_1 = arith.constant 0 : i32
    return %c0_i32, %c0_i32_0 : i32, i32
  }
  func.func @transform_8(%arg0: i32) -> (i32, i32) {
    %c0_i32 = arith.constant 0 : i32
    %c0_i32_0 = arith.constant 0 : i32
    %c0_i32_1 = arith.constant 0 : i32
    return %c0_i32, %c0_i32_0 : i32, i32
  }
  func.func @transform_9(%arg0: i32) -> (i32, i32) {
    %c0_i32 = arith.constant 0 : i32
    %c0_i32_0 = arith.constant 0 : i32
    %c0_i32_1 = arith.constant 0 : i32
    return %c0_i32, %c0_i32_0 : i32, i32
  }
  func.func @transform_10(%arg0: i32) -> (i32, i32) {
    %c0_i32 = arith.constant 0 : i32
    %c0_i32_0 = arith.constant 0 : i32
    %c0_i32_1 = arith.constant 0 : i32
    return %c0_i32, %c0_i32_0 : i32, i32
  }
  func.func @transform_11(%arg0: i32) -> (i32, i32) {
    %c0_i32 = arith.constant 0 : i32
    %c0_i32_0 = arith.constant 0 : i32
    return %arg0, %c0_i32 : i32, i32
  }
}

</mosaic_0001>

<bundles_post_ra>
// kernel: tpu_custom_call.1
= control target key start
LH: loop header
LB: loop body
LE: loop exit
PB: predicated region body
PF: predicated region fallthrough
CT: control target
= control target key end

     0   :  { %16 = vsyncpa [#allocation3], 0  ;;  %s1339_s0 = inlined_call_operand.hbm [shape: f32[8,32], index: 0, kind: input, shape index: {}]   ;;  %s1340_s1 = inlined_call_operand.hbm [shape: f32[32,128], index: 1, kind: input, shape index: {}]   ;;  %s1341_s2 = inlined_call_operand.vmem [shape: f32[1,128], index: 2, kind: input, shape index: {}]   ;;  %s1342_s3 = inlined_call_operand.hbm [shape: f32[128,128], index: 3, kind: input, shape index: {}]   ;;  %s1343_s4 = inlined_call_operand.vmem [shape: f32[1,128], index: 4, kind: input, shape index: {}]   ;;  %s1344_s5 = inlined_call_operand.hbm [shape: f32[128,128], index: 5, kind: input, shape index: {}]   ;;  %s1345_s6 = inlined_call_operand.vmem [shape: f32[1,128], index: 6, kind: input, shape index: {}]   ;;  %s1346_s7 = inlined_call_operand.hbm [shape: f32[128,128], index: 7, kind: input, shape index: {}]   ;;  %s1347_s8 = inlined_call_operand.vmem [shape: f32[1,128], index: 8, kind: input, shape index: {}]   ;;  %s1348_s9 = inlined_call_operand.hbm [shape: f32[128,128], index: 9, kind: input, shape index: {}]   ;;  %s1349_s10 = inlined_call_operand.vmem [shape: f32[1,128], index: 10, kind: input, shape index: {}]   ;;  %s1350_s11 = inlined_call_operand.hbm [shape: f32[8,10], index: 11, kind: output, shape index: {}]  }
   0x1   :  { %17 = vsyncpa [#allocation6], 0 }
   0x2   :  { %18 = vsyncpa [#allocation9], 0 }
   0x3   :  { %19 = vsyncpa [#allocation12], 0 }
   0x4   :  { %20 = vsyncpa [#allocation4], 0  ;;  %s1109_s17 = smov [#allocation5]   ;;  %s945_s21 = scalar_lea.hbm %s1340_s1, 512 }
   0x5   :  { %s36_s18 = sshll.u32 %s1109_s17, 4  ;;  %p946_p0 = scmp.ne.s32.totalorder %s1340_s1, %s945_s21  ;;  %s37_s18 = int_to_ptr.vmem [resolvable:$true] %s36_s18 }
   0x6   :  { %p949_p1 = scmp.lt.u32.totalorder %s945_s21, %s1340_s1 }
   0x8   :  { %p951_p2 = pnand %p949_p1, %p946_p0 }
   0xa   :  { %954 = shalt.err (!%p951_p2)
}
   0xb   :  { %s955_s26 = scalar_lea.vmem %s37_s18, 512  ;;  %p960_p4 = scmp.lt.s32.totalorder %s37_s18, %s37_s18 }
   0xc   :  { %p956_p3 = scmp.ne.s32.totalorder %s37_s18, %s955_s26  ;;  %p961_p5 = scmp.lt.s32.totalorder %s955_s26, %s955_s26 }
   0xe   :  { %p962_p6 = por %p961_p5, %p960_p4 }
  0x10   :  { %p963_p7 = pnand %p962_p6, %p956_p3 }
  0x12   :  { %966 = shalt.err (!%p963_p7)
}
  0x13   :  { %s1110_s27 = smov 128   ;;  %s1111_s28 = smov 8  }
  0x14   :  { %42 = dma.hbm_to_vmem [thread:$0]  %s1340_s1, 512, %s37_s18, [#allocation6], %s1110_s27, %s1110_s27, %s1111_s28  }
  0x15   :  { %s1112_s12 = smov [#allocation8]   ;;  %s1113_s14 = smov [#allocation2]  }
  0x16   :  { %s64_s13 = sshll.u32 %s1112_s12, 4  ;;  %s27_s15 = sshll.u32 %s1113_s14, 4  ;;  %s65_s13 = int_to_ptr.vmem [resolvable:$true] %s64_s13  ;;  %s28_s15 = int_to_ptr.vmem [resolvable:$true] %s27_s15 }
  0x17   :  { %s967_s19 = scalar_lea.hbm %s1344_s5, 2048 }
  0x18   :  { %p968_p8 = scmp.ne.s32.totalorder %s1344_s5, %s967_s19  ;;  %p971_p9 = scmp.lt.u32.totalorder %s967_s19, %s1344_s5 }
  0x1a   :  { %p973_p10 = pnand %p971_p9, %p968_p8 }
  0x1c   :  { %976 = shalt.err (!%p973_p10)
}
  0x1d   :  { %s977_s1 = scalar_lea.vmem %s65_s13, 2048  ;;  %p982_p12 = scmp.lt.s32.totalorder %s65_s13, %s65_s13 }
  0x1e   :  { %p978_p11 = scmp.ne.s32.totalorder %s65_s13, %s977_s1  ;;  %p983_p13 = scmp.lt.s32.totalorder %s977_s1, %s977_s1 }
  0x20   :  { %p984_p0 = por %p983_p13, %p982_p12 }
  0x22   :  { %p985_p1 = pnand %p984_p0, %p978_p11 }
  0x24   :  { %988 = shalt.err (!%p985_p1)
}
  0x25   :  { %70 = dma.hbm_to_vmem [thread:$0]  %s1344_s5, 2048, %s65_s13, [#allocation9], %s1110_s27, %s1110_s27, %s1111_s28  }
  0x26   :  { %s989_s29 = scalar_lea.hbm %s1339_s0, 128 }
  0x27   :  { %p990_p2 = scmp.ne.s32.totalorder %s1339_s0, %s989_s29  ;;  %p993_p3 = scmp.lt.u32.totalorder %s989_s29, %s1339_s0 }
  0x29   :  { %p995_p4 = pnand %p993_p3, %p990_p2 }
  0x2b   :  { %998 = shalt.err (!%p995_p4)
}
  0x2c   :  { %s999_s17 = scalar_lea.vmem %s28_s15, 128  ;;  %p1004_p6 = scmp.lt.s32.totalorder %s28_s15, %s28_s15 }
  0x2d   :  { %p1000_p5 = scmp.ne.s32.totalorder %s28_s15, %s999_s17  ;;  %p1005_p7 = scmp.lt.s32.totalorder %s999_s17, %s999_s17 }
  0x2f   :  { %p1006_p8 = por %p1005_p7, %p1004_p6 }
  0x31   :  { %p1007_p9 = pnand %p1006_p8, %p1000_p5 }
  0x33   :  { %1010 = shalt.err (!%p1007_p9)
}
  0x34   :  { %30 = dma.hbm_to_vmem [thread:$0]  %s1339_s0, 128, %s28_s15, [#allocation3]  }
  0x35   :  { %s1114_s19 = smov [#allocation7]   ;;  %s1115_s21 = smov [#allocation10]  }
  0x36   :  { %s50_s20 = sshll.u32 %s1114_s19, 4  ;;  %s78_s22 = sshll.u32 %s1115_s21, 4  ;;  %s51_s20 = int_to_ptr.vmem [resolvable:$true] %s50_s20  ;;  %s79_s22 = int_to_ptr.vmem [resolvable:$true] %s78_s22 }
  0x37   :  { %s1011_s18 = scalar_lea.hbm %s1342_s3, 2048 }
  0x38   :  { %p1012_p10 = scmp.ne.s32.totalorder %s1342_s3, %s1011_s18  ;;  %p1015_p11 = scmp.lt.u32.totalorder %s1011_s18, %s1342_s3 }
  0x3a   :  { %p1017_p12 = pnand %p1015_p11, %p1012_p10 }
  0x3c   :  { %1020 = shalt.err (!%p1017_p12)
}
  0x3d   :  { %s1021_s0 = scalar_lea.vmem %s51_s20, 2048  ;;  %p1026_p0 = scmp.lt.s32.totalorder %s51_s20, %s51_s20 }
  0x3e   :  { %p1022_p13 = scmp.ne.s32.totalorder %s51_s20, %s1021_s0  ;;  %p1027_p1 = scmp.lt.s32.totalorder %s1021_s0, %s1021_s0 }
  0x40   :  { %p1028_p2 = por %p1027_p1, %p1026_p0 }
  0x42   :  { %p1029_p3 = pnand %p1028_p2, %p1022_p13 }
  0x44   :  { %1032 = shalt.err (!%p1029_p3)
}
  0x45   :  { %56 = dma.hbm_to_vmem [thread:$0]  %s1342_s3, 2048, %s51_s20, [#allocation6], %s1110_s27, %s1110_s27, %s1111_s28  }
  0x46   :  { %s1033_s16 = scalar_lea.hbm %s1346_s7, 2048 }
  0x47   :  { %p1034_p4 = scmp.ne.s32.totalorder %s1346_s7, %s1033_s16  ;;  %p1037_p5 = scmp.lt.u32.totalorder %s1033_s16, %s1346_s7 }
  0x49   :  { %p1039_p6 = pnand %p1037_p5, %p1034_p4 }
  0x4b   :  { %1042 = shalt.err (!%p1039_p6)
}
  0x4c   :  { %s1043_s21 = scalar_lea.vmem %s79_s22, 2048  ;;  %p1048_p8 = scmp.lt.s32.totalorder %s79_s22, %s79_s22 }
  0x4d   :  { %p1044_p7 = scmp.ne.s32.totalorder %s79_s22, %s1043_s21  ;;  %p1049_p9 = scmp.lt.s32.totalorder %s1043_s21, %s1043_s21 }
  0x4f   :  { %p1050_p10 = por %p1049_p9, %p1048_p8 }
  0x51   :  { %p1051_p11 = pnand %p1050_p10, %p1044_p7 }
  0x53   :  { %1054 = shalt.err (!%p1051_p11)
}
  0x54   :  { %84 = dma.hbm_to_vmem [thread:$0]  %s1346_s7, 2048, %s79_s22, [#allocation9], %s1110_s27, %s1110_s27, %s1111_s28  }
  0x55   :  { %s1116_s23 = smov [#allocation11]   ;;  %s1055_s25 = scalar_lea.hbm %s1348_s9, 2048 }
  0x56   :  { %s92_s1 = sshll.u32 %s1116_s23, 4  ;;  %p1056_p12 = scmp.ne.s32.totalorder %s1348_s9, %s1055_s25  ;;  %s93_s1 = int_to_ptr.vmem [resolvable:$true] %s92_s1 }
  0x57   :  { %p1059_p13 = scmp.lt.u32.totalorder %s1055_s25, %s1348_s9 }
  0x59   :  { %p1061_p0 = pnand %p1059_p13, %p1056_p12 }
  0x5b   :  { %1064 = shalt.err (!%p1061_p0)
}
  0x5c   :  { %s1065_s30 = scalar_lea.vmem %s93_s1, 2048  ;;  %p1070_p2 = scmp.lt.s32.totalorder %s93_s1, %s93_s1 }
  0x5d   :  { %p1066_p1 = scmp.ne.s32.totalorder %s93_s1, %s1065_s30  ;;  %p1071_p3 = scmp.lt.s32.totalorder %s1065_s30, %s1065_s30 }
  0x5f   :  { %p1072_p4 = por %p1071_p3, %p1070_p2 }
  0x61   :  { %p1073_p5 = pnand %p1072_p4, %p1066_p1 }
  0x63   :  { %1076 = shalt.err (!%p1073_p5)
}
  0x64   :  { %98 = dma.hbm_to_vmem [thread:$0]  %s1348_s9, 2048, %s93_s1, [#allocation12], %s1110_s27, %s1110_s27, %s1111_s28  }
  0x65   :  { %1099 = dma.done.wait [#allocation3], 128  }
  0x66   :  { %1100 = vsyncadd [#allocation3], 4294967168 }
  0x67   :  { %1101 = dma.done.wait [#allocation6], 2560  }
  0x68   :  { %1102 = vsyncadd [#allocation6], 4294964736 }
  0x69   :  { %1103 = dma.done.wait [#allocation9], 4096  }
  0x6a   :  { %1104 = vsyncadd [#allocation9], 4294963200 }
  0x6b   :  { %1105 = dma.done.wait [#allocation12], 2048  }
  0x6c   :  { %1106 = vsyncadd [#allocation12], 4294965248  ;;  %v1117_v0 = vmov 0.0|0.0   ;;  %vm1118_vm0 = vmmov 0   ;;  %v1119_v1 = vmov 0.0   ;;  %v120_v2 = vld [vmem:[#allocation5] sm:$0xff] }
  0x6d   :  { %831 = vmatprep.subr.bf16.mxu0 %v1117_v0  ;;  %688 = vmatprep.mubr.msk.f32.mxu0 %vm1118_vm0, %v1119_v1  ;;  %v121_v3 = vld [vmem:[#allocation5 + $0x8] sm:$0xff]  ;;  %v122_v4 = vld [vmem:[#allocation5 + $0x10] sm:$0xff]  ;;  %v123_v6 = vld [vmem:[#allocation5 + $0x18] sm:$0xff]  ;;  %vm131_vm1 = vcmask 261120   ;;  %s1120_s5 = smov [#allocation13]   ;;  %vm581_vm2 = vcmask 80896  }
  0x6e   :  { %837 = vmatprep.subr.bf16.mxu1 %v1117_v0  ;;  %723 = vmatprep.mubr.msk.f32.mxu1 %vm1118_vm0, %v1119_v1  ;;  %v832_v5 = vpack.c.bf16 %v121_v3, %v120_v2  ;;  %v206_v7 = vld [vmem:[#allocation7] sm:$0xff]  ;;  %v207_v8 = vld [vmem:[#allocation7 + $0x8] sm:$0xff]  ;;  %v208_v9 = vld [vmem:[#allocation7 + $0x10] sm:$0xff]  ;;  %v835_v11 = vpack.c.bf16 %v123_v6, %v122_v4  ;;  %s589_s13 = sshll.u32 %s1120_s5, 4  ;;  %s590_s13 = int_to_ptr.vmem [resolvable:$true] %s589_s13 }
  0x6f   :  { %v209_v10 = vld [vmem:[#allocation7 + $0x18] sm:$0xff]  ;;  %v838_v12 = vpack.c.bf16 %v207_v8, %v206_v7  ;;  %v210_v14 = vld [vmem:[#allocation7 + $0x20] sm:$0xff]  ;;  %v211_v15 = vld [vmem:[#allocation7 + $0x28] sm:$0xff]  ;;  %s1077_s19 = scalar_lea.vmem %s590_s13, 128  ;;  %p1082_p7 = scmp.lt.s32.totalorder %s590_s13, %s590_s13 }
  0x70   :  { %833 = vmatpush3.bf16.msra.mxu0 %v832_v5  ;;  %v841_v13 = vpack.c.bf16 %v209_v10, %v208_v9  ;;  %v119_v16 = vld [vmem:[#allocation2] sm:$0xff]  ;;  %v844_v17 = vpack.c.bf16 %v211_v15, %v210_v14  ;;  %v212_v18 = vld [vmem:[#allocation7 + $0x30] sm:$0xff]  ;;  %v214_v21 = vld [vmem:[#allocation7 + $0x40] sm:$0xff]  ;;  %p1078_p6 = scmp.ne.s32.totalorder %s590_s13, %s1077_s19  ;;  %p1083_p8 = scmp.lt.s32.totalorder %s1077_s19, %s1077_s19 }
  0x71   :  { %834 = vmatprep.subr.bf16.mxu0 %v1117_v0  ;;  %839 = vmatpush3.bf16.msra.mxu1 %v838_v12  ;;  %v213_v19 = vld [vmem:[#allocation7 + $0x38] sm:$0xff]  ;;  %v215_v22 = vld [vmem:[#allocation7 + $0x48] sm:$0xff]  ;;  %v216_v24 = vld [vmem:[#allocation7 + $0x50] sm:$0xff] }
  0x72   :  { %840 = vmatprep.subr.bf16.mxu1 %v1117_v0  ;;  %v847_v20 = vpack.c.bf16 %v213_v19, %v212_v18  ;;  %v850_v23 = vpack.c.bf16 %v215_v22, %v214_v21  ;;  %v217_v25 = vld [vmem:[#allocation7 + $0x58] sm:$0xff]  ;;  %v218_v27 = vld [vmem:[#allocation7 + $0x60] sm:$0xff]  ;;  %v219_v28 = vld [vmem:[#allocation7 + $0x68] sm:$0xff]  ;;  %p1084_p9 = por %p1083_p8, %p1082_p7 }
  0x73   :  { %v853_v26 = vpack.c.bf16 %v217_v25, %v216_v24  ;;  %v856_v29 = vpack.c.bf16 %v219_v28, %v218_v27  ;;  %v220_v30 = vld [vmem:[#allocation7 + $0x70] sm:$0xff]  ;;  %v221_v31 = vld [vmem:[#allocation7 + $0x78] sm:$0xff]  ;;  %v300_v33 = vld [vmem:[#allocation8] sm:$0xff] }
  0x74   :  { %836 = vmatpush3.bf16.msra.mxu0 %v835_v11  ;;  %v859_v32 = vpack.c.bf16 %v221_v31, %v220_v30  ;;  %v301_v34 = vld [vmem:[#allocation8 + $0x8] sm:$0xff]  ;;  %v302_v35 = vld [vmem:[#allocation8 + $0x10] sm:$0xff]  ;;  %v303_v37 = vld [vmem:[#allocation8 + $0x18] sm:$0xff]  ;;  %p1085_p10 = pnand %p1084_p9, %p1078_p6 }
  0x75   :  { %861 = vmatprep.subr.bf16.mxu0 %v1117_v0  ;;  %842 = vmatpush3.bf16.msra.mxu1 %v841_v13  ;;  %v862_v36 = vpack.c.bf16 %v301_v34, %v300_v33  ;;  %v865_v38 = vpack.c.bf16 %v303_v37, %v302_v35  ;;  %v304_v39 = vld [vmem:[#allocation8 + $0x20] sm:$0xff]  ;;  %v305_v40 = vld [vmem:[#allocation8 + $0x28] sm:$0xff]  ;;  %v306_v42 = vld [vmem:[#allocation8 + $0x30] sm:$0xff] }
  0x76   :  { %843 = vmatprep.subr.bf16.mxu1 %v1117_v0  ;;  %v868_v41 = vpack.c.bf16 %v305_v40, %v304_v39  ;;  %v307_v43 = vld [vmem:[#allocation8 + $0x38] sm:$0xff]  ;;  %v308_v45 = vld [vmem:[#allocation8 + $0x40] sm:$0xff]  ;;  %v309_v46 = vld [vmem:[#allocation8 + $0x48] sm:$0xff] }
  0x77   :  { %689 = vmatmul.mubr.msk.f32.vlgmr.msra.gmra.mrb[0].mxu0 %vm131_vm1, %v119_v16  ;;  %v871_v44 = vpack.c.bf16 %v307_v43, %v306_v42  ;;  %v874_v47 = vpack.c.bf16 %v309_v46, %v308_v45  ;;  %v310_v48 = vld [vmem:[#allocation8 + $0x50] sm:$0xff]  ;;  %v311_v49 = vld [vmem:[#allocation8 + $0x58] sm:$0xff]  ;;  %v312_v51 = vld [vmem:[#allocation8 + $0x60] sm:$0xff] }
  0x78   :  { %758 = vmatprep.mubr.msk.f32.mxu0 %vm1118_vm0, %v1119_v1  ;;  %863 = vmatpush3.bf16.msra.mxu0 %v862_v36  ;;  %v877_v50 = vpack.c.bf16 %v311_v49, %v310_v48  ;;  %v313_v52 = vld [vmem:[#allocation8 + $0x68] sm:$0xff]  ;;  %v601_v54 = vld [vmem:[%s1341_s2] ss:$0 sm:$0xff]  ;;  %v314_v59 = vld [vmem:[#allocation8 + $0x70] sm:$0xff] }
  0x79   :  { %845 = vmatpush3.bf16.msra.mxu1 %v844_v17  ;;  %864 = vmatprep.subr.bf16.mxu0 %v1117_v0  ;;  %v880_v53 = vpack.c.bf16 %v313_v52, %v312_v51  ;;  %v315_v60 = vld [vmem:[#allocation8 + $0x78] sm:$0xff]  ;;  %v394_v62 = vld [vmem:[#allocation10] sm:$0xff]  ;;  %v395_v63 = vld [vmem:[#allocation10 + $0x8] sm:$0xff] }
  0x7a   :  { %846 = vmatprep.subr.bf16.mxu1 %v1117_v0  ;;  %v883_v61 = vpack.c.bf16 %v315_v60, %v314_v59  ;;  %v396_v2 = vld [vmem:[#allocation10 + $0x10] sm:$0xff]  ;;  %v886_v3 = vpack.c.bf16 %v395_v63, %v394_v62  ;;  %v397_v4 = vld [vmem:[#allocation10 + $0x18] sm:$0xff]  ;;  %v398_v6 = vld [vmem:[#allocation10 + $0x20] sm:$0xff] }
  0x7b   :  { %v889_v5 = vpack.c.bf16 %v397_v4, %v396_v2  ;;  %v399_v7 = vld [vmem:[#allocation10 + $0x28] sm:$0xff]  ;;  %v400_v9 = vld [vmem:[#allocation10 + $0x30] sm:$0xff]  ;;  %v401_v10 = vld [vmem:[#allocation10 + $0x38] sm:$0xff] }
  0x7c   :  { %866 = vmatpush3.bf16.msra.mxu0 %v865_v38  ;;  %v892_v8 = vpack.c.bf16 %v399_v7, %v398_v6  ;;  %v895_v11 = vpack.c.bf16 %v401_v10, %v400_v9  ;;  %v402_v12 = vld [vmem:[#allocation10 + $0x40] sm:$0xff]  ;;  %v403_v13 = vld [vmem:[#allocation10 + $0x48] sm:$0xff]  ;;  %v404_v15 = vld [vmem:[#allocation10 + $0x50] sm:$0xff] }
  0x7d   :  { %848 = vmatpush3.bf16.msra.mxu1 %v847_v20  ;;  %867 = vmatprep.subr.bf16.mxu0 %v1117_v0  ;;  %v898_v14 = vpack.c.bf16 %v403_v13, %v402_v12  ;;  %v405_v16 = vld [vmem:[#allocation10 + $0x58] sm:$0xff]  ;;  %v406_v18 = vld [vmem:[#allocation10 + $0x60] sm:$0xff]  ;;  %v407_v19 = vld [vmem:[#allocation10 + $0x68] sm:$0xff] }
  0x7e   :  { %849 = vmatprep.subr.bf16.mxu1 %v1117_v0  ;;  %v901_v17 = vpack.c.bf16 %v405_v16, %v404_v15  ;;  %v904_v20 = vpack.c.bf16 %v407_v19, %v406_v18  ;;  %v603_v21 = vld [vmem:[%s1343_s4] ss:$0 sm:$0xff]  ;;  %v489_v30 = vld [vmem:[#allocation11 + $0x8] sm:$0xff]  ;;  %v490_v31 = vld [vmem:[#allocation11 + $0x10] sm:$0xff] }
  0x7f   :  { %v409_v27 = vld [vmem:[#allocation10 + $0x78] sm:$0xff]  ;;  %v492_v35 = vld [vmem:[#allocation11 + $0x20] sm:$0xff]  ;;  %v493_v36 = vld [vmem:[#allocation11 + $0x28] sm:$0xff] }
  0x80   :  { %869 = vmatpush3.bf16.msra.mxu0 %v868_v41  ;;  %v491_v33 = vld [vmem:[#allocation11 + $0x18] sm:$0xff]  ;;  %v916_v37 = vpack.c.bf16 %v493_v36, %v492_v35  ;;  %v496_v40 = vld [vmem:[#allocation11 + $0x40] sm:$0xff]  ;;  %v497_v41 = vld [vmem:[#allocation11 + $0x48] sm:$0xff] }
  0x81   :  { %851 = vmatpush3.bf16.msra.mxu1 %v850_v23  ;;  %870 = vmatprep.subr.bf16.mxu0 %v1117_v0  ;;  %v913_v34 = vpack.c.bf16 %v491_v33, %v490_v31  ;;  %v495_v38 = vld [vmem:[#allocation11 + $0x38] sm:$0xff]  ;;  %v922_v42 = vpack.c.bf16 %v497_v41, %v496_v40  ;;  %v498_v43 = vld [vmem:[#allocation11 + $0x50] sm:$0xff]  ;;  %v500_v46 = vld [vmem:[#allocation11 + $0x60] sm:$0xff] }
  0x82   :  { %852 = vmatprep.subr.bf16.mxu1 %v1117_v0  ;;  %v604_v49 = vld [vmem:[%s1345_s6] ss:$0 sm:$0xff] }
  0x84   :  { %872 = vmatpush3.bf16.msra.mxu0 %v871_v44  ;;  %v499_v44 = vld [vmem:[#allocation11 + $0x58] sm:$0xff] }
  0x85   :  { %854 = vmatpush3.bf16.msra.mxu1 %v853_v26  ;;  %873 = vmatprep.subr.bf16.mxu0 %v1117_v0  ;;  %v408_v26 = vld [vmem:[#allocation10 + $0x70] sm:$0xff]  ;;  %v925_v45 = vpack.c.bf16 %v499_v44, %v498_v43 }
  0x86   :  { %855 = vmatprep.subr.bf16.mxu1 %v1117_v0  ;;  %v907_v28 = vpack.c.bf16 %v409_v27, %v408_v26 }
  0x88   :  { %875 = vmatpush3.bf16.msra.mxu0 %v874_v47  ;;  %v501_v47 = vld [vmem:[#allocation11 + $0x68] sm:$0xff] }
  0x89   :  { %857 = vmatpush3.bf16.msra.mxu1 %v856_v29  ;;  %876 = vmatprep.subr.bf16.mxu0 %v1117_v0  ;;  %v488_v29 = vld [vmem:[#allocation11] sm:$0xff]  ;;  %v928_v48 = vpack.c.bf16 %v501_v47, %v500_v46 }
  0x8a   :  { %858 = vmatprep.subr.bf16.mxu1 %v1117_v0 }
  0x8c   :  { %878 = vmatpush3.bf16.msra.mxu0 %v877_v50 }
  0x8d   :  { %860 = vmatpush3.bf16.msra.mxu1 %v859_v32  ;;  %879 = vmatprep.subr.bf16.mxu0 %v1117_v0  ;;  %v910_v32 = vpack.c.bf16 %v489_v30, %v488_v29 }
  0x8e   :  { %885 = vmatprep.subr.bf16.mxu1 %v1117_v0 }
  0x90   :  { %881 = vmatpush3.bf16.msra.mxu0 %v880_v53 }
  0x91   :  { %882 = vmatprep.subr.bf16.mxu0 %v1117_v0 }
  0x94   :  { %884 = vmatpush3.bf16.msra.mxu0 %v883_v61  ;;  %v606_v61 = vld [vmem:[%s1349_s10] ss:$0 sm:$0xff] }
  0x95   :  { %909 = vmatprep.subr.bf16.mxu0 %v1117_v0 }
 0x14a   :  { %v201_v55 = vpop.f32.mrb[0].mxu0 }
 0x14b   :  { %v202_v56 = vadd.f32 %v601_v54, %v201_v55  ;;  %v690_v57 = vpop.f32.mrb[1].mxu0  ;;  %v502_v54 = vld [vmem:[#allocation11 + $0x70] sm:$0xff]  ;;  %v503_v55 = vld [vmem:[#allocation11 + $0x78] sm:$0xff] }
 0x14c   :  { %v605_v57 = vld [vmem:[%s1347_s8] ss:$0 sm:$0xff] }
 0x14d   :  { %v205_v58 = vmax.f32 %v202_v56, 0.0  ;;  %v931_v56 = vpack.c.bf16 %v503_v55, %v502_v54 }
 0x14f   :  { %724 = vmatmul.mubr.f32.vlgmr.msra.gmra.mrb[0].mxu1 %v205_v58 }
 0x150   :  { %793 = vmatprep.mubr.msk.f32.mxu1 %vm1118_vm0, %v1119_v1  ;;  %887 = vmatpush3.bf16.msra.mxu1 %v886_v3 }
 0x151   :  { %888 = vmatprep.subr.bf16.mxu1 %v1117_v0 }
 0x154   :  { %890 = vmatpush3.bf16.msra.mxu1 %v889_v5 }
 0x155   :  { %891 = vmatprep.subr.bf16.mxu1 %v1117_v0 }
 0x158   :  { %893 = vmatpush3.bf16.msra.mxu1 %v892_v8 }
 0x159   :  { %894 = vmatprep.subr.bf16.mxu1 %v1117_v0 }
 0x15c   :  { %896 = vmatpush3.bf16.msra.mxu1 %v895_v11 }
 0x15d   :  { %897 = vmatprep.subr.bf16.mxu1 %v1117_v0 }
 0x160   :  { %899 = vmatpush3.bf16.msra.mxu1 %v898_v14 }
 0x161   :  { %900 = vmatprep.subr.bf16.mxu1 %v1117_v0 }
 0x164   :  { %902 = vmatpush3.bf16.msra.mxu1 %v901_v17 }
 0x165   :  { %903 = vmatprep.subr.bf16.mxu1 %v1117_v0 }
 0x168   :  { %905 = vmatpush3.bf16.msra.mxu1 %v904_v20 }
 0x169   :  { %906 = vmatprep.subr.bf16.mxu1 %v1117_v0 }
 0x16c   :  { %908 = vmatpush3.bf16.msra.mxu1 %v907_v28 }
 0x222   :  { %v295_v22 = vpop.f32.mrb[0].mxu1 }
 0x223   :  { %v296_v23 = vadd.f32 %v603_v21, %v295_v22  ;;  %v725_v24 = vpop.f32.mrb[1].mxu1 }
 0x225   :  { %v299_v25 = vmax.f32 %v296_v23, 0.0 }
 0x227   :  { %759 = vmatmul.mubr.f32.vlgmr.msra.gmra.mrb[2].mxu0 %v299_v25 }
 0x228   :  { %828 = vmatprep.mubr.msk.f32.mxu0 %vm1118_vm0, %v1119_v1  ;;  %911 = vmatpush3.bf16.msra.mxu0 %v910_v32  ;;  %v494_v1 = vld [vmem:[#allocation11 + $0x30] sm:$0xff] }
 0x229   :  { %912 = vmatprep.subr.bf16.mxu0 %v1117_v0  ;;  %v919_v39 = vpack.c.bf16 %v495_v38, %v494_v1 }
 0x22c   :  { %914 = vmatpush3.bf16.msra.mxu0 %v913_v34 }
 0x22d   :  { %915 = vmatprep.subr.bf16.mxu0 %v1117_v0 }
 0x230   :  { %917 = vmatpush3.bf16.msra.mxu0 %v916_v37 }
 0x231   :  { %918 = vmatprep.subr.bf16.mxu0 %v1117_v0 }
 0x234   :  { %920 = vmatpush3.bf16.msra.mxu0 %v919_v39 }
 0x235   :  { %921 = vmatprep.subr.bf16.mxu0 %v1117_v0 }
 0x238   :  { %923 = vmatpush3.bf16.msra.mxu0 %v922_v42 }
 0x239   :  { %924 = vmatprep.subr.bf16.mxu0 %v1117_v0 }
 0x23c   :  { %926 = vmatpush3.bf16.msra.mxu0 %v925_v45 }
 0x23d   :  { %927 = vmatprep.subr.bf16.mxu0 %v1117_v0 }
 0x240   :  { %929 = vmatpush3.bf16.msra.mxu0 %v928_v48 }
 0x241   :  { %930 = vmatprep.subr.bf16.mxu0 %v1117_v0 }
 0x244   :  { %932 = vmatpush3.bf16.msra.mxu0 %v931_v56 }
 0x2fa   :  { %v389_v50 = vpop.f32.mrb[2].mxu0 }
 0x2fb   :  { %v390_v51 = vadd.f32 %v604_v49, %v389_v50  ;;  %v760_v52 = vpop.f32.mrb[3].mxu0 }
 0x2fd   :  { %v393_v53 = vmax.f32 %v390_v51, 0.0 }
 0x2ff   :  { %794 = vmatmul.mubr.f32.vlgmr.msra.gmra.mrb[2].mxu1 %v393_v53 }
 0x3d2   :  { %v483_v58 = vpop.f32.mrb[2].mxu1 }
 0x3d3   :  { %v484_v59 = vadd.f32 %v605_v57, %v483_v58  ;;  %v795_v0 = vpop.f32.mrb[3].mxu1 }
 0x3d5   :  { %v487_v60 = vmax.f32 %v484_v59, 0.0 }
 0x3d7   :  { %829 = vmatmul.mubr.f32.vlgmr.msra.gmra.mrb[4].mxu0 %v487_v60 }
 0x4aa   :  { %v577_v62 = vpop.f32.mrb[4].mxu0 }
 0x4ab   :  { %v578_v63 = vadd.f32 %v606_v61, %v577_v62  ;;  %v830_v2 = vpop.f32.mrb[5].mxu0 }
 0x4ad   :  { %582 = vst.msk [vmem:[#allocation13] sm:$0xff] %vm581_vm2, %v578_v63 }
 0x4ae   :  { %1088 = shalt.err (!%p1085_p10)
}
 0x4af   :  { %s1089_s3 = scalar_lea.hbm %s1350_s11, 128 }
 0x4b0   :  { %p1090_p11 = scmp.ne.s32.totalorder %s1350_s11, %s1089_s3  ;;  %p1093_p12 = scmp.lt.u32.totalorder %s1089_s3, %s1350_s11 }
 0x4b2   :  { %p1095_p13 = pnand %p1093_p12, %p1090_p11 }
 0x4b4   :  { %1098 = shalt.err (!%p1095_p13)
}
 0x4b5   :  { %592 = dma.vmem_to_hbm [thread:$0]  %s590_s13, 128, %s1350_s11, [#allocation4]  }
 0x4b6   :  { %1107 = dma.done.wait [#allocation4], 128  }
 0x4b7   :  { %1108 = vsyncadd [#allocation4], 4294967168 }
 0x4b8   :  { %596 = vsyncpa [#allocation3], 1 }
 0x4b9   :  { %597 = vsyncpa [#allocation6], 1 }
 0x4ba   :  { %598 = vsyncpa [#allocation9], 1 }
 0x4bb   :  { %599 = vsyncpa [#allocation12], 1 }
 0x4bc   :  { %600 = vsyncpa [#allocation4], 1 }

</bundles_post_ra>
